<compile_context>
chip_gen: v7x
topology: tpu7x:2x2x1
jax: 0.10.0
libtpu: 0.0.40
codegen_flags: <defaults>
</compile_context>

<pallas_src>
import functools

import jax
import jax.numpy as jnp
from jax import lax
from jax.experimental import pallas as pl
from jax.experimental.pallas import tpu as pltpu

# Finite mask value: real scores never approach it, exp() of it underflows to 0,
# and (unlike -inf) it cannot create NaNs in the online-softmax rescale.
NEG_INF = -1e9


# ------------------------------ tiling helpers -------------------------------


def _pick_dst_tile(n):
    """Destination-row tile (sublane-ish axis): biggest even divisor <= 256."""
    if n <= 256:
        return n
    for t in (256, 128, 64, 32, 16, 8):
        if n % t == 0:
            return t
    return n


def _pick_src_tile(n):
    """Source tile (lane axis of the adjacency block): multiple of 128 or full."""
    if n <= 512:
        return n
    for t in (512, 256, 128):
        if n % t == 0:
            return t
    return n


# ----------------------------- projection kernel -----------------------------


def _linear_kernel(x_ref, w_ref, o_ref):
    # (TM, Fin) @ (Fin, H*D) on the MXU -> lane-dense (TM, H*D) output.
    o_ref[...] = jnp.dot(
        x_ref[...], w_ref[...], preferred_element_type=jnp.float32
    ).astype(o_ref.dtype)


def linear(x, w):
    """Row-tiled projection: (N, Fin) @ (Fin, H*D) -> (N, H*D)."""
    N, F = x.shape
    O = w.shape[1]
    tm = _pick_dst_tile(N)
    return pl.pallas_call(
        _linear_kernel,
        out_shape=jax.ShapeDtypeStruct((N, O), jnp.float32),
        grid=(N // tm,),
        in_specs=[
            pl.BlockSpec((tm, F), lambda i: (i, 0)),
            pl.BlockSpec((F, O), lambda i: (0, 0)),
        ],
        out_specs=pl.BlockSpec((tm, O), lambda i: (i, 0)),
        compiler_params=pltpu.CompilerParams(dimension_semantics=("parallel",)),
    )(x, w)


# ----------------------------- attention kernel -------------------------------


def _gat_attention_kernel(featd_ref, feats_ref, al_ref, ar_ref, adj_ref,
                          bias_ref, o_ref, m_sc, l_sc, acc_sc, *,
                          num_heads, head_dim, negative_slope, apply_relu):
    # featd_ref : (TQ, H*D)  projected features of this tile's DESTINATION nodes
    # feats_ref : (TS, H*D)  projected features of this step's SOURCE nodes
    # al/ar/bias: (1, H*D)
    # adj_ref   : (TQ, TS) int8, adj[dst, src] != 0 means edge src -> dst
    # scratch   : m_sc/l_sc (H, TQ, 1), acc_sc (H, TQ, D) -- online softmax state
    ki = pl.program_id(1)

    @pl.when(ki == 0)
    def _init():
        m_sc[...] = jnp.full(m_sc.shape, NEG_INF, m_sc.dtype)
        l_sc[...] = jnp.zeros(l_sc.shape, l_sc.dtype)
        acc_sc[...] = jnp.zeros(acc_sc.shape, acc_sc.dtype)

    feat_dst = featd_ref[...]
    feat_src = feats_ref[...]
    edge = adj_ref[...] != 0          # int8 stays int8 in HBM; one compare here

    for h in range(num_heads):        # H is 1 or 3: unrolled at trace time
        lo = h * head_dim
        f_src = feat_src[:, lo:lo + head_dim]        # (TS, D)
        f_dst = feat_dst[:, lo:lo + head_dim]        # (TQ, D)
        al = al_ref[:, lo:lo + head_dim]             # (1, D)
        ar = ar_ref[:, lo:lo + head_dim]             # (1, D)

        # el[src] lane-dense straight off the MXU (no transpose),
        # er[dst] as a column via a VPU/XLU reduce over the dst tile.
        el_row = lax.dot_general(
            al, f_src, dimension_numbers=(((1,), (1,)), ((), ())),
            preferred_element_type=jnp.float32,
        )                                                     # (1, TS)
        er_col = jnp.sum(f_dst * ar, axis=-1, keepdims=True)  # (TQ, 1)

        # scores[dst, src] = leaky_relu(el[src] + er[dst]), edge-masked.
        s = er_col + el_row                                   # (TQ, TS)
        s = jnp.where(s > 0, s, negative_slope * s)
        s = jnp.where(edge, s, NEG_INF)

        m_prev = m_sc[h]                                      # (TQ, 1)
        l_prev = l_sc[h]                                      # (TQ, 1)
        acc_prev = acc_sc[h]                                  # (TQ, D)

        # Online softmax update across source tiles.
        m_cur = jnp.max(s, axis=-1, keepdims=True)
        m_new = jnp.maximum(m_prev, m_cur)
        alpha = jnp.exp(m_prev - m_new)                       # rescale old state
        p = jnp.exp(s - m_new)                                # (TQ, TS)
        p = jnp.where(edge, p, 0.0)   # rows with no edge in this tile stay clean

        m_sc[h] = m_new
        l_sc[h] = alpha * l_prev + jnp.sum(p, axis=-1, keepdims=True)
        acc_sc[h] = alpha * acc_prev + jnp.dot(
            p, f_src, preferred_element_type=jnp.float32)     # MXU aggregate

    @pl.when(ki == pl.num_programs(1) - 1)
    def _finalize():
        # Normalize the small (TQ, D) accumulators with an EUP approx reciprocal
        # (instead of dividing the (TQ, TS) score matrices), fuse bias + ReLU,
        # store one lane-dense (TQ, H*D) slab.
        outs = [acc_sc[h] * pl.reciprocal(l_sc[h], approx=True)
                for h in range(num_heads)]
        out = outs[0] if num_heads == 1 else jnp.concatenate(outs, axis=-1)
        out = out + bias_ref[...]
        if apply_relu:
            out = jnp.maximum(out, 0.0)
        o_ref[...] = out.astype(o_ref.dtype)


def gat_attention(feat, attn_l, attn_r, adj, bias, *, num_heads, head_dim,
                  negative_slope=0.2, apply_relu=False, tq=None, ts=None):
    N, HD = feat.shape
    assert HD == num_heads * head_dim
    tq = _pick_dst_tile(N) if tq is None else tq
    ts = _pick_src_tile(N) if ts is None else ts
    assert N % tq == 0 and N % ts == 0

    kernel = functools.partial(
        _gat_attention_kernel,
        num_heads=num_heads, head_dim=head_dim,
        negative_slope=negative_slope, apply_relu=apply_relu,
    )
    return pl.pallas_call(
        kernel,
        out_shape=jax.ShapeDtypeStruct((N, HD), jnp.float32),
        grid=(N // tq, N // ts),
        in_specs=[
            pl.BlockSpec((tq, HD), lambda qi, ki: (qi, 0)),   # dst feature tile
            pl.BlockSpec((ts, HD), lambda qi, ki: (ki, 0)),   # src feature tile
            pl.BlockSpec((1, HD), lambda qi, ki: (0, 0)),     # attn_l (all heads)
            pl.BlockSpec((1, HD), lambda qi, ki: (0, 0)),     # attn_r (all heads)
            pl.BlockSpec((tq, ts), lambda qi, ki: (qi, ki)),  # int8 adjacency
            pl.BlockSpec((1, HD), lambda qi, ki: (0, 0)),     # bias
        ],
        out_specs=pl.BlockSpec((tq, HD), lambda qi, ki: (qi, 0)),
        scratch_shapes=[
            pltpu.VMEM((num_heads, tq, 1), jnp.float32),         # running max
            pltpu.VMEM((num_heads, tq, 1), jnp.float32),         # running denom
            pltpu.VMEM((num_heads, tq, head_dim), jnp.float32),  # running numer
        ],
        compiler_params=pltpu.CompilerParams(
            dimension_semantics=("parallel", "arbitrary")),
    )(feat, feat, attn_l, attn_r, adj, bias)


# ----------------------------- layer / model glue ----------------------------


def gat_conv(h, adj, p, *, apply_relu, tq=None, ts=None):
    feat = linear(h, p["w"])            # (N, H*D), lane-dense, no transpose
    return gat_attention(
        feat, p["attn_l"], p["attn_r"], adj, p["bias"],
        num_heads=p["num_heads"], head_dim=p["out_feats"],
        apply_relu=apply_relu, tq=tq, ts=ts,
    )                                   # (N, H*D) == .flatten(1)


def _init_gatconv(key, in_feats, out_feats, num_heads):
    kw, kl, kr = jax.random.split(key, 3)
    scale = 1.0 / jnp.sqrt(jnp.float32(in_feats))
    hd = num_heads * out_feats
    return {
        "w": jax.random.normal(kw, (in_feats, hd), jnp.float32) * scale,
        "attn_l": jax.random.normal(kl, (1, hd), jnp.float32) * 0.1,
        "attn_r": jax.random.normal(kr, (1, hd), jnp.float32) * 0.1,
        "bias": jnp.zeros((1, hd), jnp.float32),
        "num_heads": num_heads,
        "out_feats": out_feats,
    }


def init_gat_params(key, in_size, out_size, hid_size, nlayers):
    layers = []
    keys = jax.random.split(key, max(nlayers, 1))
    if nlayers == 1:
        layers.append(_init_gatconv(keys[0], in_size, out_size, num_heads=1))
    else:
        layers.append(_init_gatconv(keys[0], in_size, hid_size, num_heads=3))
        for i in range(nlayers - 2):
            layers.append(_init_gatconv(keys[1 + i], hid_size * 3, hid_size,
                                        num_heads=3))
        layers.append(_init_gatconv(keys[nlayers - 1], hid_size * 3, out_size,
                                    num_heads=1))
    return layers


def gat_forward(params, adj, features, *, tq=None, ts=None):
    # TODO(synk): dropout treated as identity (eval mode); edge_weight=None only.
    h = features
    last = len(params) - 1
    for i, p in enumerate(params):
        h = gat_conv(h, adj, p, apply_relu=(i != last), tq=tq, ts=ts)
    return h


# ------------------------- pure-JAX reference (check) ------------------------


def _gat_conv_ref(h, adj, p, *, apply_relu):
    H, D = p["num_heads"], p["out_feats"]
    N = h.shape[0]
    feat = jnp.dot(h, p["w"], precision=lax.Precision.HIGHEST).reshape(N, H, D)
    el = jnp.sum(feat * p["attn_l"].reshape(1, H, D), axis=-1)   # (N, H) per src
    er = jnp.sum(feat * p["attn_r"].reshape(1, H, D), axis=-1)   # (N, H) per dst
    e = er[:, None, :] + el[None, :, :]                          # (dst, src, H)
    e = jnp.where(e > 0, e, 0.2 * e)
    e = jnp.where((adj != 0)[:, :, None], e, -jnp.inf)
    a = jax.nn.softmax(e, axis=1)
    out = jnp.einsum("dsh,shf->dhf", a, feat,
                     precision=lax.Precision.HIGHEST).reshape(N, H * D)
    out = out + p["bias"]
    return jnp.maximum(out, 0.0) if apply_relu else out


def gat_forward_ref(params, adj, features):
    h = features
    last = len(params) - 1
    for i, p in enumerate(params):
        h = _gat_conv_ref(h, adj, p, apply_relu=(i != last))
    return h


# ----------------------------------- main ------------------------------------

if __name__ == "__main__":
    # Small but tiling-exercising demo: 256 nodes with 128-row / 128-col tiles
    # gives a (2, 2) grid (parallel dst tiles x online-softmax src steps).
    N, in_size, hid_size, out_size, nlayers = 256, 32, 32, 8, 2

    key = jax.random.PRNGKey(0)
    k_feat, k_adj, k_param = jax.random.split(key, 3)

    features = jax.random.normal(k_feat, (N, in_size), dtype=jnp.float32)
    # Dense adjacency mask, int8, adj[dst, src]; self-loops guarantee every
    # destination row is non-empty (required by the masked softmax).
    adj = (jax.random.uniform(k_adj, (N, N)) < 0.05).astype(jnp.int8)
    adj = jnp.maximum(adj, jnp.eye(N, dtype=jnp.int8))

    params = init_gat_params(k_param, in_size, out_size, hid_size, nlayers)

    out = gat_forward(params, adj, features, tq=128, ts=128)
    out = jax.block_until_ready(out)

    assert out.shape == (N, out_size), out.shape
    assert bool(jnp.all(jnp.isfinite(out)))

    ref = gat_forward_ref(params, adj, features)
    max_err = float(jnp.max(jnp.abs(out - ref)))
    assert max_err < 5e-2, f"max abs error vs reference: {max_err}"

    print("KERNEL_OK")
</pallas_src>

<mosaic_0001>
module attributes {stable_mosaic.version = 11 : i64} {
  func.func @_linear_kernel(%arg0: i32, %arg1: memref<256x32xf32, #tpu.memory_space<vmem>>, %arg2: memref<32x96xf32, #tpu.memory_space<vmem>>, %arg3: memref<256x96xf32, #tpu.memory_space<vmem>>) attributes {dimension_semantics = [#tpu.dimension_semantics<parallel>], iteration_bounds = array<i64: 1>, scalar_prefetch = 0 : i64, scratch_operands = 0 : i64, tpu.core_type = #tpu.core_type<tc>, window_params = [{transform_indices = @transform_0, window_bounds = array<i64: 256, 32>}, {pipeline_mode = #tpu.pipeline_mode<synchronous>, transform_indices = @transform_1, window_bounds = array<i64: 32, 96>}, {transform_indices = @transform_2, window_bounds = array<i64: 256, 96>}]} {
    %c0 = arith.constant 0 : index
    %c0_0 = arith.constant 0 : index
    %0 = vector.load %arg1[%c0, %c0_0] : memref<256x32xf32, #tpu.memory_space<vmem>>, vector<256x32xf32>
    %c0_1 = arith.constant 0 : index
    %c0_2 = arith.constant 0 : index
    %1 = vector.load %arg2[%c0_1, %c0_2] : memref<32x96xf32, #tpu.memory_space<vmem>>, vector<32x96xf32>
    %cst = arith.constant dense<0.000000e+00> : vector<256x96xf32>
    %2 = tpu.matmul %0, %1, %cst {dimension_numbers = #tpu.dot_dimension_numbers<[1], [0], [0], [1], [0, 0, 1, 1], [], []>} : vector<256x32xf32>, vector<32x96xf32>, vector<256x96xf32> -> vector<256x96xf32>
    %c0_3 = arith.constant 0 : index
    %c0_4 = arith.constant 0 : index
    %3 = vector.load %arg3[%c0_3, %c0_4] : memref<256x96xf32, #tpu.memory_space<vmem>>, vector<256x96xf32>
    tpu.vector_store %arg3[%c0_3, %c0_4], %2 {strides = array<i32>} : memref<256x96xf32, #tpu.memory_space<vmem>>, vector<256x96xf32>,
    return
  }
  func.func @transform_0(%arg0: i32) -> (i32, i32) {
    %c0_i32 = arith.constant 0 : i32
    %c0_i32_0 = arith.constant 0 : i32
    return %arg0, %c0_i32 : i32, i32
  }
  func.func @transform_1(%arg0: i32) -> (i32, i32) {
    %c0_i32 = arith.constant 0 : i32
    %c0_i32_0 = arith.constant 0 : i32
    %c0_i32_1 = arith.constant 0 : i32
    return %c0_i32, %c0_i32_0 : i32, i32
  }
  func.func @transform_2(%arg0: i32) -> (i32, i32) {
    %c0_i32 = arith.constant 0 : i32
    %c0_i32_0 = arith.constant 0 : i32
    return %arg0, %c0_i32 : i32, i32
  }
}

</mosaic_0001>

<bundles_post_ra>
// kernel: tpu_custom_call.1
= control target key start
LH: loop header
LB: loop body
LE: loop exit
PB: predicated region body
PF: predicated region fallthrough
CT: control target
= control target key end

     0   :  { %vm47_vm0 = vcmask 261120   ;;  %vm369_vm1 = vcmask 785408   ;;  %s825_s1 = inlined_call_operand.vmem [shape: f32[32,96], index: 1, kind: input, shape index: {}]   ;;  %s826_s0 = inlined_call_operand.vmem [shape: f32[256,32], index: 0, kind: input, shape index: {}]   ;;  %s827_s2 = inlined_call_operand.vmem [shape: f32[256,96], index: 2, kind: output, shape index: {}]  }
   0x1   :  { %v43_v0 = vld [vmem:[%s825_s1] sm:$0xff]  ;;  %v44_v1 = vld [vmem:[%s825_s1 + $0x8] sm:$0xff]  ;;  %v45_v2 = vld [vmem:[%s825_s1 + $0x10] sm:$0xff] }
   0x2   :  { %v530_v3 = vpack.c.bf16 %v44_v1, %v43_v0  ;;  %v46_v4 = vld [vmem:[%s825_s1 + $0x18] sm:$0xff]  ;;  %v11_v5 = vld [vmem:[%s826_s0] sm:$0xff]  ;;  %v12_v8 = vld [vmem:[%s826_s0 + $0x8] sm:$0xff] }
   0x3   :  { %v27_v6 = vld [vmem:[%s826_s0 + $0x80] sm:$0xff]  ;;  %v534_v7 = vpack.c.bf16 %v46_v4, %v45_v2  ;;  %482 = vmatprep.mubr.msk.f32.mxu0 %vm47_vm0, %v11_v5  ;;  %v28_v9 = vld [vmem:[%s826_s0 + $0x88] sm:$0xff]  ;;  %v13_v10 = vld [vmem:[%s826_s0 + $0x10] sm:$0xff] }
   0x4   :  { %506 = vmatprep.mubr.msk.f32.mxu1 %vm47_vm0, %v27_v6  ;;  %531 = vmatprep.subr.bf16.mxu0 %v530_v3  ;;  %v29_v11 = vld [vmem:[%s826_s0 + $0x90] sm:$0xff]  ;;  %v14_v12 = vld [vmem:[%s826_s0 + $0x18] sm:$0xff]  ;;  %v15_v14 = vld [vmem:[%s826_s0 + $0x20] sm:$0xff] }
   0x5   :  { %538 = vmatprep.subr.bf16.mxu1 %v530_v3  ;;  %533 = vmatpush3.bf16.msra.mxu0 %v530_v3  ;;  %v30_v13 = vld [vmem:[%s826_s0 + $0x98] sm:$0xff]  ;;  %v31_v15 = vld [vmem:[%s826_s0 + $0xa0] sm:$0xff]  ;;  %v16_v16 = vld [vmem:[%s826_s0 + $0x28] sm:$0xff] }
   0x6   :  { %540 = vmatpush3.bf16.msra.mxu1 %v530_v3  ;;  %535 = vmatprep.subr.bf16.mxu0 %v534_v7  ;;  %v32_v17 = vld [vmem:[%s826_s0 + $0xa8] sm:$0xff]  ;;  %v17_v18 = vld [vmem:[%s826_s0 + $0x30] sm:$0xff]  ;;  %v18_v20 = vld [vmem:[%s826_s0 + $0x38] sm:$0xff] }
   0x7   :  { %539 = vmatprep.subr.bf16.mxu1 %v534_v7  ;;  %v33_v19 = vld [vmem:[%s826_s0 + $0xb0] sm:$0xff]  ;;  %v34_v21 = vld [vmem:[%s826_s0 + $0xb8] sm:$0xff]  ;;  %v19_v22 = vld [vmem:[%s826_s0 + $0x40] sm:$0xff] }
   0x8   :  { %v35_v23 = vld [vmem:[%s826_s0 + $0xc0] sm:$0xff]  ;;  %v20_v24 = vld [vmem:[%s826_s0 + $0x48] sm:$0xff]  ;;  %v21_v26 = vld [vmem:[%s826_s0 + $0x50] sm:$0xff] }
   0x9   :  { %537 = vmatpush3.bf16.msra.mxu0 %v534_v7  ;;  %v36_v25 = vld [vmem:[%s826_s0 + $0xc8] sm:$0xff]  ;;  %v37_v27 = vld [vmem:[%s826_s0 + $0xd0] sm:$0xff]  ;;  %v22_v28 = vld [vmem:[%s826_s0 + $0x58] sm:$0xff] }
   0xa   :  { %541 = vmatpush3.bf16.msra.mxu1 %v534_v7  ;;  %v38_v29 = vld [vmem:[%s826_s0 + $0xd8] sm:$0xff]  ;;  %v23_v30 = vld [vmem:[%s826_s0 + $0x60] sm:$0xff]  ;;  %v24_v32 = vld [vmem:[%s826_s0 + $0x68] sm:$0xff] }
   0xb   :  { %v39_v31 = vld [vmem:[%s826_s0 + $0xe0] sm:$0xff]  ;;  %v40_v33 = vld [vmem:[%s826_s0 + $0xe8] sm:$0xff]  ;;  %v25_v34 = vld [vmem:[%s826_s0 + $0x70] sm:$0xff] }
   0xc   :  { %483 = vmatmul.mubr.msk.f32.vlgmr.msra.gmra.mrb[0].mxu0 %vm47_vm0, %v12_v8  ;;  %v41_v35 = vld [vmem:[%s826_s0 + $0xf0] sm:$0xff]  ;;  %v26_v36 = vld [vmem:[%s826_s0 + $0x78] sm:$0xff] }
   0xd   :  { %507 = vmatmul.mubr.msk.f32.vlgmr.msra.gmra.mrb[0].mxu1 %vm47_vm0, %v28_v9  ;;  %485 = vmatprep.mubr.msk.f32.mxu0 %vm47_vm0, %v13_v10  ;;  %v42_v37 = vld [vmem:[%s826_s0 + $0xf8] sm:$0xff] }
   0xe   :  { %509 = vmatprep.mubr.msk.f32.mxu1 %vm47_vm0, %v29_v11 }
  0x10   :  { %486 = vmatmul.mubr.msk.f32.gmra.mrb[2].mxu0 %vm47_vm0, %v14_v12 }
  0x11   :  { %510 = vmatmul.mubr.msk.f32.gmra.mrb[2].mxu1 %vm47_vm0, %v30_v13  ;;  %488 = vmatprep.mubr.msk.f32.mxu0 %vm47_vm0, %v15_v14 }
  0x12   :  { %512 = vmatprep.mubr.msk.f32.mxu1 %vm47_vm0, %v31_v15 }
  0x14   :  { %489 = vmatmul.mubr.msk.f32.gmra.mrb[4].mxu0 %vm47_vm0, %v16_v16 }
  0x15   :  { %513 = vmatmul.mubr.msk.f32.gmra.mrb[4].mxu1 %vm47_vm0, %v32_v17  ;;  %491 = vmatprep.mubr.msk.f32.mxu0 %vm47_vm0, %v17_v18 }
  0x16   :  { %515 = vmatprep.mubr.msk.f32.mxu1 %vm47_vm0, %v33_v19 }
  0x18   :  { %492 = vmatmul.mubr.msk.f32.gmra.mrb[6].mxu0 %vm47_vm0, %v18_v20 }
  0x19   :  { %516 = vmatmul.mubr.msk.f32.gmra.mrb[6].mxu1 %vm47_vm0, %v34_v21  ;;  %494 = vmatprep.mubr.msk.f32.mxu0 %vm47_vm0, %v19_v22 }
  0x1a   :  { %518 = vmatprep.mubr.msk.f32.mxu1 %vm47_vm0, %v35_v23 }
  0x1c   :  { %495 = vmatmul.mubr.msk.f32.gmra.mrb[8].mxu0 %vm47_vm0, %v20_v24 }
  0x1d   :  { %519 = vmatmul.mubr.msk.f32.gmra.mrb[8].mxu1 %vm47_vm0, %v36_v25  ;;  %497 = vmatprep.mubr.msk.f32.mxu0 %vm47_vm0, %v21_v26 }
  0x1e   :  { %521 = vmatprep.mubr.msk.f32.mxu1 %vm47_vm0, %v37_v27 }
  0x20   :  { %498 = vmatmul.mubr.msk.f32.gmra.mrb[10].mxu0 %vm47_vm0, %v22_v28 }
  0x21   :  { %522 = vmatmul.mubr.msk.f32.gmra.mrb[10].mxu1 %vm47_vm0, %v38_v29  ;;  %500 = vmatprep.mubr.msk.f32.mxu0 %vm47_vm0, %v23_v30 }
  0x22   :  { %524 = vmatprep.mubr.msk.f32.mxu1 %vm47_vm0, %v39_v31 }
  0x24   :  { %501 = vmatmul.mubr.msk.f32.gmra.mrb[12].mxu0 %vm47_vm0, %v24_v32 }
  0x25   :  { %525 = vmatmul.mubr.msk.f32.gmra.mrb[12].mxu1 %vm47_vm0, %v40_v33  ;;  %503 = vmatprep.mubr.msk.f32.mxu0 %vm47_vm0, %v25_v34 }
  0x26   :  { %527 = vmatprep.mubr.msk.f32.mxu1 %vm47_vm0, %v41_v35 }
  0x28   :  { %504 = vmatmul.mubr.msk.f32.gmra.mrb[14].mxu0 %vm47_vm0, %v26_v36 }
  0x29   :  { %528 = vmatmul.mubr.msk.f32.gmra.mrb[14].mxu1 %vm47_vm0, %v42_v37 }
  0xdf   :  { %v484_v38 = vpop.f32.mrb[0].mxu0 }
  0xe0   :  { %v508_v39 = vpop.f32.mrb[0].mxu1  ;;  %371 = vst.msk [vmem:[%s827_s2 + $0x8] sm:$0xff] %vm369_vm1, %v484_v38  ;;  %v210_v40 = vpop.f32.mrb[1].mxu0 }
  0xe1   :  { %387 = vst.msk [vmem:[%s827_s2 + $0x88] sm:$0xff] %vm369_vm1, %v508_v39  ;;  %v290_v41 = vpop.f32.mrb[1].mxu1  ;;  %370 = vst.msk [vmem:[%s827_s2] sm:$0xff] %vm369_vm1, %v210_v40 }
  0xe2   :  { %386 = vst.msk [vmem:[%s827_s2 + $0x80] sm:$0xff] %vm369_vm1, %v290_v41 }
  0xe3   :  { %v487_v42 = vpop.f32.mrb[2].mxu0 }
  0xe4   :  { %v511_v43 = vpop.f32.mrb[2].mxu1  ;;  %373 = vst.msk [vmem:[%s827_s2 + $0x18] sm:$0xff] %vm369_vm1, %v487_v42  ;;  %v220_v44 = vpop.f32.mrb[3].mxu0 }
  0xe5   :  { %389 = vst.msk [vmem:[%s827_s2 + $0x98] sm:$0xff] %vm369_vm1, %v511_v43  ;;  %v300_v45 = vpop.f32.mrb[3].mxu1  ;;  %372 = vst.msk [vmem:[%s827_s2 + $0x10] sm:$0xff] %vm369_vm1, %v220_v44 }
  0xe6   :  { %388 = vst.msk [vmem:[%s827_s2 + $0x90] sm:$0xff] %vm369_vm1, %v300_v45 }
  0xe7   :  { %v490_v46 = vpop.f32.mrb[4].mxu0 }
  0xe8   :  { %v514_v47 = vpop.f32.mrb[4].mxu1  ;;  %375 = vst.msk [vmem:[%s827_s2 + $0x28] sm:$0xff] %vm369_vm1, %v490_v46  ;;  %v230_v48 = vpop.f32.mrb[5].mxu0 }
  0xe9   :  { %391 = vst.msk [vmem:[%s827_s2 + $0xa8] sm:$0xff] %vm369_vm1, %v514_v47  ;;  %v310_v49 = vpop.f32.mrb[5].mxu1  ;;  %374 = vst.msk [vmem:[%s827_s2 + $0x20] sm:$0xff] %vm369_vm1, %v230_v48 }
  0xea   :  { %390 = vst.msk [vmem:[%s827_s2 + $0xa0] sm:$0xff] %vm369_vm1, %v310_v49 }
  0xeb   :  { %v493_v50 = vpop.f32.mrb[6].mxu0 }
  0xec   :  { %v517_v51 = vpop.f32.mrb[6].mxu1  ;;  %377 = vst.msk [vmem:[%s827_s2 + $0x38] sm:$0xff] %vm369_vm1, %v493_v50  ;;  %v240_v52 = vpop.f32.mrb[7].mxu0 }
  0xed   :  { %393 = vst.msk [vmem:[%s827_s2 + $0xb8] sm:$0xff] %vm369_vm1, %v517_v51  ;;  %v320_v53 = vpop.f32.mrb[7].mxu1  ;;  %376 = vst.msk [vmem:[%s827_s2 + $0x30] sm:$0xff] %vm369_vm1, %v240_v52 }
  0xee   :  { %392 = vst.msk [vmem:[%s827_s2 + $0xb0] sm:$0xff] %vm369_vm1, %v320_v53 }
  0xef   :  { %v496_v54 = vpop.f32.mrb[8].mxu0 }
  0xf0   :  { %v520_v55 = vpop.f32.mrb[8].mxu1  ;;  %379 = vst.msk [vmem:[%s827_s2 + $0x48] sm:$0xff] %vm369_vm1, %v496_v54  ;;  %v250_v56 = vpop.f32.mrb[9].mxu0 }
  0xf1   :  { %395 = vst.msk [vmem:[%s827_s2 + $0xc8] sm:$0xff] %vm369_vm1, %v520_v55  ;;  %v330_v57 = vpop.f32.mrb[9].mxu1  ;;  %378 = vst.msk [vmem:[%s827_s2 + $0x40] sm:$0xff] %vm369_vm1, %v250_v56 }
  0xf2   :  { %394 = vst.msk [vmem:[%s827_s2 + $0xc0] sm:$0xff] %vm369_vm1, %v330_v57 }
  0xf3   :  { %v499_v58 = vpop.f32.mrb[10].mxu0 }
  0xf4   :  { %v523_v59 = vpop.f32.mrb[10].mxu1  ;;  %381 = vst.msk [vmem:[%s827_s2 + $0x58] sm:$0xff] %vm369_vm1, %v499_v58  ;;  %v260_v60 = vpop.f32.mrb[11].mxu0 }
  0xf5   :  { %397 = vst.msk [vmem:[%s827_s2 + $0xd8] sm:$0xff] %vm369_vm1, %v523_v59  ;;  %v340_v61 = vpop.f32.mrb[11].mxu1  ;;  %380 = vst.msk [vmem:[%s827_s2 + $0x50] sm:$0xff] %vm369_vm1, %v260_v60 }
  0xf6   :  { %396 = vst.msk [vmem:[%s827_s2 + $0xd0] sm:$0xff] %vm369_vm1, %v340_v61 }
  0xf7   :  { %v502_v62 = vpop.f32.mrb[12].mxu0 }
  0xf8   :  { %v526_v63 = vpop.f32.mrb[12].mxu1  ;;  %383 = vst.msk [vmem:[%s827_s2 + $0x68] sm:$0xff] %vm369_vm1, %v502_v62  ;;  %v270_v0 = vpop.f32.mrb[13].mxu0 }
  0xf9   :  { %399 = vst.msk [vmem:[%s827_s2 + $0xe8] sm:$0xff] %vm369_vm1, %v526_v63  ;;  %v350_v1 = vpop.f32.mrb[13].mxu1  ;;  %382 = vst.msk [vmem:[%s827_s2 + $0x60] sm:$0xff] %vm369_vm1, %v270_v0 }
  0xfa   :  { %398 = vst.msk [vmem:[%s827_s2 + $0xe0] sm:$0xff] %vm369_vm1, %v350_v1 }
  0xfb   :  { %v505_v2 = vpop.f32.mrb[14].mxu0 }
  0xfc   :  { %v529_v3 = vpop.f32.mrb[14].mxu1  ;;  %385 = vst.msk [vmem:[%s827_s2 + $0x78] sm:$0xff] %vm369_vm1, %v505_v2  ;;  %v280_v4 = vpop.f32.mrb[15].mxu0 }
  0xfd   :  { %401 = vst.msk [vmem:[%s827_s2 + $0xf8] sm:$0xff] %vm369_vm1, %v529_v3  ;;  %v360_v5 = vpop.f32.mrb[15].mxu1  ;;  %384 = vst.msk [vmem:[%s827_s2 + $0x70] sm:$0xff] %vm369_vm1, %v280_v4 }
  0xfe   :  { %400 = vst.msk [vmem:[%s827_s2 + $0xf0] sm:$0xff] %vm369_vm1, %v360_v5 }

</bundles_post_ra>
